<compile_context>
chip_gen: v7x
topology: tpu7x:2x2x1
jax: 0.10.0
libtpu: 0.0.40
codegen_flags: <defaults>
</compile_context>

<pallas_src>
import functools

import jax
import jax.numpy as jnp
from jax.experimental import pallas as pl
from jax.experimental.pallas import tpu as pltpu


def _rnn_kernel(tok_ref, emb_ref, wih_ref, whh_ref, b_ref, wcls_ref, bcls_ref,
                out_ref, *, T, b_block):
    """One batch block: fused embedding lookup + RNN recurrence + classifier.

    tok_ref:  (T*b_block, 1) int32  token ids, time-major within the batch block
    emb_ref:  (V_pad, D)  f32       embedding table (row 0 = padding_idx, zero)
    wih_ref:  (D, D)      f32       W_ih^T  (x @ W)
    whh_ref:  (D, D)      f32       W_hh^T  (h @ W)
    b_ref:    (1, D)      f32       b_ih + b_hh
    wcls_ref: (D, 128)    f32       W_cls^T zero-padded to 128 lanes
    bcls_ref: (1, 128)    f32       b_cls zero-padded to 128 lanes
    out_ref:  (b_block, 128) f32    lane-dense logits block
    """
    n = T * b_block
    v_pad, d = emb_ref.shape

    # ---- embedding gather as a one-hot matmul (MXU), hoisted for all steps ----
    tok = tok_ref[...]                                            # (n, 1) int32
    vocab_iota = jax.lax.broadcasted_iota(jnp.int32, (n, v_pad), 1)
    one_hot = (tok == vocab_iota).astype(jnp.float32)             # (n, V_pad)

    # Fold input projection AND the RNN bias into the table once:
    #   row_v = emb[v] @ W_ih + (b_ih + b_hh)
    # Since each one-hot row has exactly one 1, one_hot @ table == x@W_ih + b.
    emb_proj = jnp.dot(emb_ref[...], wih_ref[...],
                       preferred_element_type=jnp.float32) + b_ref[...]  # (V_pad, D)
    pre_all = jnp.dot(one_hot, emb_proj,
                      preferred_element_type=jnp.float32)         # (n, D)

    # ---- serial recurrence: only h @ W_hh + tanh on the critical path --------
    w_hh = whh_ref[...]
    h = jnp.zeros((b_block, d), jnp.float32)
    for t in range(T):  # static unroll (T is small); RHS stays MXU-resident
        pre_t = pre_all[t * b_block:(t + 1) * b_block, :]          # aligned 8-row slice
        h = jnp.tanh(pre_t + jnp.dot(h, w_hh,
                                     preferred_element_type=jnp.float32))

    # ---- classifier on last hidden state, lane-dense (128-wide) store -------
    logits = (jnp.dot(h, wcls_ref[...], preferred_element_type=jnp.float32)
              + bcls_ref[...])                                    # (b_block, 128)
    out_ref[...] = logits.astype(out_ref.dtype)


def init_params(key, vocab_size, vector_dim, sentence_length):
    """Deterministic synthetic parameter init (shapes match the torch module)."""
    k_emb, k_wih, k_whh, k_bih, k_bhh, k_wc, k_bc = jax.random.split(key, 7)
    scale = 1.0 / jnp.sqrt(vector_dim)
    num_classes = sentence_length + 1

    embedding = jax.random.normal(k_emb, (vocab_size, vector_dim),
                                  jnp.float32) * 0.1
    embedding = embedding.at[0].set(0.0)       # padding_idx=0 -> zero row

    # PyTorch stores W as (hidden, input) and computes x @ W^T; we init the
    # transposed (input, hidden) matrices directly.
    w_ih_t = jax.random.uniform(k_wih, (vector_dim, vector_dim), jnp.float32,
                                -scale, scale)
    w_hh_t = jax.random.uniform(k_whh, (vector_dim, vector_dim), jnp.float32,
                                -scale, scale)
    b_ih = jax.random.uniform(k_bih, (vector_dim,), jnp.float32, -scale, scale)
    b_hh = jax.random.uniform(k_bhh, (vector_dim,), jnp.float32, -scale, scale)
    b_rnn = (b_ih + b_hh).reshape(1, vector_dim)

    w_cls_t = jax.random.uniform(k_wc, (vector_dim, num_classes), jnp.float32,
                                 -scale, scale)
    b_cls = jax.random.uniform(k_bc, (num_classes,), jnp.float32,
                               -scale, scale).reshape(1, num_classes)

    return dict(embedding=embedding, w_ih_t=w_ih_t, w_hh_t=w_hh_t,
                b_rnn=b_rnn, w_cls_t=w_cls_t, b_cls=b_cls)


def rnn_work_model_forward(tokens, params, *, b_block=8):
    """tokens: int32 (B, T).  Returns logits (B, sentence_length + 1)."""
    emb = params["embedding"]            # (V, D)
    w_ih = params["w_ih_t"]              # (D, D)
    w_hh = params["w_hh_t"]              # (D, D)
    b_rnn = params["b_rnn"]              # (1, D)
    w_cls = params["w_cls_t"]            # (D, C)
    b_cls = params["b_cls"]              # (1, C)

    B, T = tokens.shape
    V, D = emb.shape
    C = w_cls.shape[1]

    # Pad vocab rows to a sublane multiple (zero rows; tokens never index them).
    V_PAD = ((V + 7) // 8) * 8
    emb_p = jnp.zeros((V_PAD, D), emb.dtype).at[:V, :].set(emb)

    # Lane-dense classifier: pad C -> 128 with zero columns (numerics unchanged).
    C_PAD = 128
    w_cls_p = jnp.zeros((D, C_PAD), w_cls.dtype).at[:, :C].set(w_cls)
    b_cls_p = jnp.zeros((1, C_PAD), b_cls.dtype).at[:, :C].set(b_cls)

    # Batch blocking: parallel grid axis (v7x: 2 TCs split the batch).
    b_block = min(b_block, B)
    assert B % b_block == 0, "batch must be divisible by b_block"
    nb = B // b_block
    n_blk = T * b_block

    # tokens (B, T) -> rows grouped by batch block, time-major inside a block:
    # row index = j*n_blk + t*b_block + b_local   (tiny int32 layout op).
    tok_rows = (tokens.reshape(nb, b_block, T)
                      .transpose(0, 2, 1)
                      .reshape(nb * n_blk, 1)
                      .astype(jnp.int32))

    kernel = functools.partial(_rnn_kernel, T=T, b_block=b_block)

    out = pl.pallas_call(
        kernel,
        out_shape=jax.ShapeDtypeStruct((B, C_PAD), jnp.float32),
        grid=(nb,),
        in_specs=[
            pl.BlockSpec((n_blk, 1), lambda j: (j, 0)),     # token ids (per block)
            pl.BlockSpec((V_PAD, D), lambda j: (0, 0)),     # embedding table
            pl.BlockSpec((D, D), lambda j: (0, 0)),         # W_ih^T
            pl.BlockSpec((D, D), lambda j: (0, 0)),         # W_hh^T
            pl.BlockSpec((1, D), lambda j: (0, 0)),         # b_ih + b_hh
            pl.BlockSpec((D, C_PAD), lambda j: (0, 0)),     # W_cls^T (padded)
            pl.BlockSpec((1, C_PAD), lambda j: (0, 0)),     # b_cls (padded)
        ],
        out_specs=pl.BlockSpec((b_block, C_PAD), lambda j: (j, 0)),
        compiler_params=pltpu.CompilerParams(
            dimension_semantics=("parallel",),
            vmem_limit_bytes=4 * 1024 * 1024,
        ),
    )(tok_rows, emb_p, w_ih, w_hh, b_rnn, w_cls_p, b_cls_p)

    return out[:, :C]


def rnn_work_model_reference(tokens, params):
    """Pure-JAX reference of the torch forward for validation."""
    emb = params["embedding"][tokens]                # (B, T, D)
    B, T, D = emb.shape
    h = jnp.zeros((B, D), jnp.float32)
    for t in range(T):
        h = jnp.tanh(emb[:, t, :] @ params["w_ih_t"]
                     + h @ params["w_hh_t"] + params["b_rnn"])
    return h @ params["w_cls_t"] + params["b_cls"]


# TODO(synk): training branch (cross_entropy loss when y is provided) is not
# implemented; this kernel covers the inference forward (logits) path only.

if __name__ == "__main__":
    vector_dim = 32
    sentence_length = 8
    vocab_size = 27            # 26 chars + pad (padding_idx=0)
    batch = 16

    key = jax.random.PRNGKey(0)
    k_params, k_tokens = jax.random.split(key)

    params = init_params(k_params, vocab_size, vector_dim, sentence_length)
    tokens = jax.random.randint(k_tokens, (batch, sentence_length),
                                0, vocab_size, dtype=jnp.int32)

    fwd = jax.jit(rnn_work_model_forward)
    logits = fwd(tokens, params)
    logits = jax.block_until_ready(logits)

    ref = rnn_work_model_reference(tokens, params)
    assert logits.shape == (batch, sentence_length + 1)
    assert jnp.allclose(logits, ref, rtol=1e-5, atol=1e-5)

    print("KERNEL_OK")
</pallas_src>

<mosaic_0001>
module attributes {stable_mosaic.version = 11 : i64} {
  func.func @_rnn_kernel(%arg0: i32, %arg1: memref<64x1xi32, #tpu.memory_space<vmem>>, %arg2: memref<32x32xf32, #tpu.memory_space<vmem>>, %arg3: memref<32x32xf32, #tpu.memory_space<vmem>>, %arg4: memref<32x32xf32, #tpu.memory_space<vmem>>, %arg5: memref<1x32xf32, #tpu.memory_space<vmem>>, %arg6: memref<32x128xf32, #tpu.memory_space<vmem>>, %arg7: memref<1x128xf32, #tpu.memory_space<vmem>>, %arg8: memref<8x128xf32, #tpu.memory_space<vmem>>) attributes {dimension_semantics = [#tpu.dimension_semantics<parallel>], iteration_bounds = array<i64: 2>, scalar_prefetch = 0 : i64, scratch_operands = 0 : i64, tpu.core_type = #tpu.core_type<tc>, window_params = [{transform_indices = @transform_0, window_bounds = array<i64: 64, 1>}, {pipeline_mode = #tpu.pipeline_mode<synchronous>, transform_indices = @transform_1, window_bounds = array<i64: 32, 32>}, {pipeline_mode = #tpu.pipeline_mode<synchronous>, transform_indices = @transform_2, window_bounds = array<i64: 32, 32>}, {pipeline_mode = #tpu.pipeline_mode<synchronous>, transform_indices = @transform_3, window_bounds = array<i64: 32, 32>}, {pipeline_mode = #tpu.pipeline_mode<synchronous>, transform_indices = @transform_4, window_bounds = array<i64: 1, 32>}, {pipeline_mode = #tpu.pipeline_mode<synchronous>, transform_indices = @transform_5, window_bounds = array<i64: 32, 128>}, {pipeline_mode = #tpu.pipeline_mode<synchronous>, transform_indices = @transform_6, window_bounds = array<i64: 1, 128>}, {transform_indices = @transform_7, window_bounds = array<i64: 8, 128>}]} {
    %c0 = arith.constant 0 : index
    %c0_0 = arith.constant 0 : index
    %0 = vector.load %arg1[%c0, %c0_0] : memref<64x1xi32, #tpu.memory_space<vmem>>, vector<64x1xi32>
    %1 = tpu.iota {dimensions = array<i32: 1>} : vector<64x32xi32>
    %2 = vector.broadcast %0 : vector<64x1xi32> to vector<64x32xi32>
    %3 = arith.cmpi eq, %2, %1 : vector<64x32xi32>
    %4 = arith.extui %3 : vector<64x32xi1> to vector<64x32xi32>
    %5 = arith.sitofp %4 : vector<64x32xi32> to vector<64x32xf32>
    %c0_1 = arith.constant 0 : index
    %c0_2 = arith.constant 0 : index
    %6 = vector.load %arg2[%c0_1, %c0_2] : memref<32x32xf32, #tpu.memory_space<vmem>>, vector<32x32xf32>
    %c0_3 = arith.constant 0 : index
    %c0_4 = arith.constant 0 : index
    %7 = vector.load %arg3[%c0_3, %c0_4] : memref<32x32xf32, #tpu.memory_space<vmem>>, vector<32x32xf32>
    %cst = arith.constant dense<0.000000e+00> : vector<32x32xf32>
    %8 = tpu.matmul %6, %7, %cst {dimension_numbers = #tpu.dot_dimension_numbers<[1], [0], [0], [1], [0, 0, 1, 1], [], []>} : vector<32x32xf32>, vector<32x32xf32>, vector<32x32xf32> -> vector<32x32xf32>
    %c0_5 = arith.constant 0 : index
    %c0_6 = arith.constant 0 : index
    %9 = vector.load %arg5[%c0_5, %c0_6] : memref<1x32xf32, #tpu.memory_space<vmem>>, vector<1x32xf32>
    %10 = vector.broadcast %9 : vector<1x32xf32> to vector<32x32xf32>
    %11 = arith.addf %8, %10 : vector<32x32xf32>
    %cst_7 = arith.constant dense<0.000000e+00> : vector<64x32xf32>
    %12 = tpu.matmul %5, %11, %cst_7 {dimension_numbers = #tpu.dot_dimension_numbers<[1], [0], [0], [1], [0, 0, 1, 1], [], []>} : vector<64x32xf32>, vector<32x32xf32>, vector<64x32xf32> -> vector<64x32xf32>
    %c0_8 = arith.constant 0 : index
    %c0_9 = arith.constant 0 : index
    %13 = vector.load %arg4[%c0_8, %c0_9] : memref<32x32xf32, #tpu.memory_space<vmem>>, vector<32x32xf32>
    %cst_10 = arith.constant 0.000000e+00 : f32
    %14 = vector.broadcast %cst_10 : f32 to vector<8x32xf32>
    %15 = vector.extract_strided_slice %12 {offsets = [0, 0], sizes = [8, 32], strides = [1, 1]} : vector<64x32xf32> to vector<8x32xf32>
    %cst_11 = arith.constant dense<0.000000e+00> : vector<8x32xf32>
    %16 = tpu.matmul %14, %13, %cst_11 {dimension_numbers = #tpu.dot_dimension_numbers<[1], [0], [0], [1], [0, 0, 1, 1], [], []>} : vector<8x32xf32>, vector<32x32xf32>, vector<8x32xf32> -> vector<8x32xf32>
    %17 = arith.addf %15, %16 : vector<8x32xf32>
    %18 = math.tanh %17 : vector<8x32xf32>
    %19 = vector.extract_strided_slice %12 {offsets = [8, 0], sizes = [8, 32], strides = [1, 1]} : vector<64x32xf32> to vector<8x32xf32>
    %cst_12 = arith.constant dense<0.000000e+00> : vector<8x32xf32>
    %20 = tpu.matmul %18, %13, %cst_12 {dimension_numbers = #tpu.dot_dimension_numbers<[1], [0], [0], [1], [0, 0, 1, 1], [], []>} : vector<8x32xf32>, vector<32x32xf32>, vector<8x32xf32> -> vector<8x32xf32>
    %21 = arith.addf %19, %20 : vector<8x32xf32>
    %22 = math.tanh %21 : vector<8x32xf32>
    %23 = vector.extract_strided_slice %12 {offsets = [16, 0], sizes = [8, 32], strides = [1, 1]} : vector<64x32xf32> to vector<8x32xf32>
    %cst_13 = arith.constant dense<0.000000e+00> : vector<8x32xf32>
    %24 = tpu.matmul %22, %13, %cst_13 {dimension_numbers = #tpu.dot_dimension_numbers<[1], [0], [0], [1], [0, 0, 1, 1], [], []>} : vector<8x32xf32>, vector<32x32xf32>, vector<8x32xf32> -> vector<8x32xf32>
    %25 = arith.addf %23, %24 : vector<8x32xf32>
    %26 = math.tanh %25 : vector<8x32xf32>
    %27 = vector.extract_strided_slice %12 {offsets = [24, 0], sizes = [8, 32], strides = [1, 1]} : vector<64x32xf32> to vector<8x32xf32>
    %cst_14 = arith.constant dense<0.000000e+00> : vector<8x32xf32>
    %28 = tpu.matmul %26, %13, %cst_14 {dimension_numbers = #tpu.dot_dimension_numbers<[1], [0], [0], [1], [0, 0, 1, 1], [], []>} : vector<8x32xf32>, vector<32x32xf32>, vector<8x32xf32> -> vector<8x32xf32>
    %29 = arith.addf %27, %28 : vector<8x32xf32>
    %30 = math.tanh %29 : vector<8x32xf32>
    %31 = vector.extract_strided_slice %12 {offsets = [32, 0], sizes = [8, 32], strides = [1, 1]} : vector<64x32xf32> to vector<8x32xf32>
    %cst_15 = arith.constant dense<0.000000e+00> : vector<8x32xf32>
    %32 = tpu.matmul %30, %13, %cst_15 {dimension_numbers = #tpu.dot_dimension_numbers<[1], [0], [0], [1], [0, 0, 1, 1], [], []>} : vector<8x32xf32>, vector<32x32xf32>, vector<8x32xf32> -> vector<8x32xf32>
    %33 = arith.addf %31, %32 : vector<8x32xf32>
    %34 = math.tanh %33 : vector<8x32xf32>
    %35 = vector.extract_strided_slice %12 {offsets = [40, 0], sizes = [8, 32], strides = [1, 1]} : vector<64x32xf32> to vector<8x32xf32>
    %cst_16 = arith.constant dense<0.000000e+00> : vector<8x32xf32>
    %36 = tpu.matmul %34, %13, %cst_16 {dimension_numbers = #tpu.dot_dimension_numbers<[1], [0], [0], [1], [0, 0, 1, 1], [], []>} : vector<8x32xf32>, vector<32x32xf32>, vector<8x32xf32> -> vector<8x32xf32>
    %37 = arith.addf %35, %36 : vector<8x32xf32>
    %38 = math.tanh %37 : vector<8x32xf32>
    %39 = vector.extract_strided_slice %12 {offsets = [48, 0], sizes = [8, 32], strides = [1, 1]} : vector<64x32xf32> to vector<8x32xf32>
    %cst_17 = arith.constant dense<0.000000e+00> : vector<8x32xf32>
    %40 = tpu.matmul %38, %13, %cst_17 {dimension_numbers = #tpu.dot_dimension_numbers<[1], [0], [0], [1], [0, 0, 1, 1], [], []>} : vector<8x32xf32>, vector<32x32xf32>, vector<8x32xf32> -> vector<8x32xf32>
    %41 = arith.addf %39, %40 : vector<8x32xf32>
    %42 = math.tanh %41 : vector<8x32xf32>
    %43 = vector.extract_strided_slice %12 {offsets = [56, 0], sizes = [8, 32], strides = [1, 1]} : vector<64x32xf32> to vector<8x32xf32>
    %cst_18 = arith.constant dense<0.000000e+00> : vector<8x32xf32>
    %44 = tpu.matmul %42, %13, %cst_18 {dimension_numbers = #tpu.dot_dimension_numbers<[1], [0], [0], [1], [0, 0, 1, 1], [], []>} : vector<8x32xf32>, vector<32x32xf32>, vector<8x32xf32> -> vector<8x32xf32>
    %45 = arith.addf %43, %44 : vector<8x32xf32>
    %46 = math.tanh %45 : vector<8x32xf32>
    %c0_19 = arith.constant 0 : index
    %c0_20 = arith.constant 0 : index
    %47 = vector.load %arg6[%c0_19, %c0_20] : memref<32x128xf32, #tpu.memory_space<vmem>>, vector<32x128xf32>
    %cst_21 = arith.constant dense<0.000000e+00> : vector<8x128xf32>
    %48 = tpu.matmul %46, %47, %cst_21 {dimension_numbers = #tpu.dot_dimension_numbers<[1], [0], [0], [1], [0, 0, 1, 1], [], []>} : vector<8x32xf32>, vector<32x128xf32>, vector<8x128xf32> -> vector<8x128xf32>
    %c0_22 = arith.constant 0 : index
    %c0_23 = arith.constant 0 : index
    %49 = vector.load %arg7[%c0_22, %c0_23] : memref<1x128xf32, #tpu.memory_space<vmem>>, vector<1x128xf32>
    %50 = vector.broadcast %49 : vector<1x128xf32> to vector<8x128xf32>
    %51 = arith.addf %48, %50 : vector<8x128xf32>
    %c0_24 = arith.constant 0 : index
    %c0_25 = arith.constant 0 : index
    %52 = vector.load %arg8[%c0_24, %c0_25] : memref<8x128xf32, #tpu.memory_space<vmem>>, vector<8x128xf32>
    tpu.vector_store %arg8[%c0_24, %c0_25], %51 {strides = array<i32>} : memref<8x128xf32, #tpu.memory_space<vmem>>, vector<8x128xf32>,
    return
  }
  func.func @transform_0(%arg0: i32) -> (i32, i32) {
    %c0_i32 = arith.constant 0 : i32
    %c0_i32_0 = arith.constant 0 : i32
    return %arg0, %c0_i32 : i32, i32
  }
  func.func @transform_1(%arg0: i32) -> (i32, i32) {
    %c0_i32 = arith.constant 0 : i32
    %c0_i32_0 = arith.constant 0 : i32
    %c0_i32_1 = arith.constant 0 : i32
    return %c0_i32, %c0_i32_0 : i32, i32
  }
  func.func @transform_2(%arg0: i32) -> (i32, i32) {
    %c0_i32 = arith.constant 0 : i32
    %c0_i32_0 = arith.constant 0 : i32
    %c0_i32_1 = arith.constant 0 : i32
    return %c0_i32, %c0_i32_0 : i32, i32
  }
  func.func @transform_3(%arg0: i32) -> (i32, i32) {
    %c0_i32 = arith.constant 0 : i32
    %c0_i32_0 = arith.constant 0 : i32
    %c0_i32_1 = arith.constant 0 : i32
    return %c0_i32, %c0_i32_0 : i32, i32
  }
  func.func @transform_4(%arg0: i32) -> (i32, i32) {
    %c0_i32 = arith.constant 0 : i32
    %c0_i32_0 = arith.constant 0 : i32
    %c0_i32_1 = arith.constant 0 : i32
    return %c0_i32, %c0_i32_0 : i32, i32
  }
  func.func @transform_5(%arg0: i32) -> (i32, i32) {
    %c0_i32 = arith.constant 0 : i32
    %c0_i32_0 = arith.constant 0 : i32
    %c0_i32_1 = arith.constant 0 : i32
    return %c0_i32, %c0_i32_0 : i32, i32
  }
  func.func @transform_6(%arg0: i32) -> (i32, i32) {
    %c0_i32 = arith.constant 0 : i32
    %c0_i32_0 = arith.constant 0 : i32
    %c0_i32_1 = arith.constant 0 : i32
    return %c0_i32, %c0_i32_0 : i32, i32
  }
  func.func @transform_7(%arg0: i32) -> (i32, i32) {
    %c0_i32 = arith.constant 0 : i32
    %c0_i32_0 = arith.constant 0 : i32
    return %arg0, %c0_i32 : i32, i32
  }
}

</mosaic_0001>

<bundles_post_ra>
// kernel: rnn_work_model_forward.1
= control target key start
LH: loop header
LB: loop body
LE: loop exit
PB: predicated region body
PF: predicated region fallthrough
CT: control target
= control target key end

     0   :  { %12 = vsyncpa [#allocation3], 0  ;;  %s2081_s0 = inlined_call_operand.vmem [shape: s32[128,1], index: 0, kind: input, shape index: {}]   ;;  %s2082_s1 = inlined_call_operand.vmem [shape: f32[32,32], index: 1, kind: input, shape index: {}]   ;;  %s2083_s2 = inlined_call_operand.vmem [shape: f32[32,32], index: 2, kind: input, shape index: {}]   ;;  %s2084_s3 = inlined_call_operand.vmem [shape: f32[32,32], index: 3, kind: input, shape index: {}]   ;;  %s2085_s4 = inlined_call_operand.vmem [shape: f32[1,32], index: 4, kind: input, shape index: {}]   ;;  %s2086_s5 = inlined_call_operand.vmem [shape: f32[32,128], index: 5, kind: input, shape index: {}]   ;;  %s2087_s6 = inlined_call_operand.vmem [shape: f32[1,128], index: 6, kind: input, shape index: {}]   ;;  %s2088_s7 = inlined_call_operand.hbm [shape: f32[16,128], index: 7, kind: output, shape index: {}]  }
   0x1   :  { %14 = vsyncpa [#allocation3 + $0x1], 0  ;;  %s1820_s24 = smov 0   ;;  %s1822_s25 = smov 0  }
   0x2   :  { %s1824_s26 = smov 0   ;;  %s1826_s27 = smov 0  }
   0x3 LB: > { %s1841_s28 = sadd.s32 4294967295, %s1773_s27   ;;  %s1341_s29 = sadd.s32 4294967294, %s1773_s27   ;;  %s1773_s27 = sphi %s1826_s27, %s2094_s27   ;;  %s1769_s26 = sphi %s1824_s26, %s2093_s26   ;;  %s1765_s25 = sphi %s1822_s25, %s2092_s25   ;;  %s1761_s24 = sphi %s1820_s24, %s2091_s24  }
   0x4   : > { %s1845_s30 = sadd.s32 1, %s1773_s27   ;;  %s179_s8 = sadd.s32 1, %s1769_s26 }
   0x5   : > { %s176_s9 = ssub.s32 %s1773_s27, %s1845_s30  ;;  %p189_p0 = scmp.ne.s32.totalorder %s1769_s26, %s1765_s25 }
   0x6   : > { %p177_p1 = scmp.eq.s32.totalorder %s176_s9, 0  ;;  %p190_p2 = scmp.eq.s32.totalorder %s1841_s28, 1 }
   0x7   : > { %p195_p3 = scmp.ne.s32.totalorder %s1765_s25, %s1761_s24  ;;  %p196_p4 = scmp.eq.s32.totalorder %s1341_s29, 1 }
   0x8   : > { %s1856_s10 = scalar_select %p177_p1, %s1769_s26, %s179_s8  }
   0x9   : > { %p1858_p5 = por %p190_p2, %p189_p0  ;;  %p1862_p6 = por %p196_p4, %p195_p3 }
   0xa   : > { %p1344_p7 = scmp.ge.s32.totalorder %s1773_s27, 1  ;;  %p241_p8 = scmp.lt.s32.totalorder %s1773_s27, 3 }
   0xc   : > { %p242_p9 = pnand %p1344_p7, %p241_p8 }
   0xd   : > { %v341_v0 = vld [vmem:[%s2083_s2] sm:$0xff] (!%p242_p9)  ;;  %v342_v1 = vld [vmem:[%s2083_s2 + $0x8] sm:$0xff] (!%p242_p9)  ;;  %v343_v2 = vld [vmem:[%s2083_s2 + $0x10] sm:$0xff] (!%p242_p9)  ;;  %vm352_vm0 = vcmask (!%p242_p9), 261120   ;;  %s1346_s19 = sshll.u32 (!%p242_p9), %s1841_s28, 3  ;;  %v1775_v6 = vmov (!%p242_p9), 0   ;;  %v287_v26 = vlaneseq (!%p242_p9) }
   0xe   : > { %245 = sbr.rel (%p242_p9) target bundleno = 2278 (0x8e6), region = 48  ;;  %v1580_v3 = vpack.c.bf16 (!%p242_p9), %v342_v1, %v341_v0  ;;  %v344_v4 = vld [vmem:[%s2083_s2 + $0x18] sm:$0xff] (!%p242_p9)  ;;  %v337_v5 = vld [vmem:[%s2082_s1] sm:$0xff] (!%p242_p9)  ;;  %1693 = vset.pattern.permute.xlu0 (!%p242_p9), %v1775_v6  ;;  %p274_p10 = scmp.lt.s32.totalorder (!%p242_p9), %s1346_s19, 15  ;;  %1694 = vset.pattern.permute.xlu1 (!%p242_p9), %v1775_v6  ;;  %v338_v9 = vld [vmem:[%s2082_s1 + $0x8] sm:$0xff] (!%p242_p9)  ;;  %v1776_v21 = vmov (!%p242_p9), 0.0|0.0  }
   0xf   : > { %v1584_v7 = vpack.c.bf16 (!%p242_p9), %v344_v4, %v343_v2  ;;  %1455 = vmatprep.mubr.msk.f32.mxu0 (!%p242_p9), %vm352_vm0, %v337_v5  ;;  %v339_v11 = vld [vmem:[%s2082_s1 + $0x10] sm:$0xff] (!%p242_p9)  ;;  %v340_v14 = vld [vmem:[%s2082_s1 + $0x18] sm:$0xff] (!%p242_p9)  ;;  %v579_v18 = vld [vmem:[%s2084_s3] sm:$0xff] (!%p242_p9)  ;;  %vm1777_vm1 = vmmov (!%p242_p9), 0   ;;  %v1778_v25 = vmov (!%p242_p9), 0.0   ;;  %v1939_v27 = vand.u32 (!%p242_p9), 127, %v287_v26 }
  0x10   : > { %1581 = vmatprep.subr.bf16.mxu0 (!%p242_p9), %v1580_v3  ;;  %v580_v19 = vld [vmem:[%s2084_s3 + $0x8] sm:$0xff] (!%p242_p9)  ;;  %v581_v22 = vld [vmem:[%s2084_s3 + $0x10] sm:$0xff] (!%p242_p9)  ;;  %v582_v23 = vld [vmem:[%s2084_s3 + $0x18] sm:$0xff] (!%p242_p9)  ;;  %s1379_s15 = sshll.u32 (!%p242_p9), %s1841_s28, 7  ;;  %s1779_s28 = smov (!%p242_p9), [#allocation2]  }
  0x11   : > { %1583 = vmatpush3.bf16.msra.mxu0 (!%p242_p9), %v1580_v3  ;;  %v1915_v20 = vpack.c.bf16 (!%p242_p9), %v580_v19, %v579_v18  ;;  %v1926_v24 = vpack.c.bf16 (!%p242_p9), %v582_v23, %v581_v22  ;;  %v1356_v30 = vld [vmem:[%s2085_s4] ss:$0 sm:$0xff] (!%p242_p9)  ;;  %s1715_s22 = sshll.u32 (!%p242_p9), %s1779_s28, 4  ;;  %s1716_s22 = int_to_ptr.vmem [resolvable:$false] %s1715_s22 }
  0x12   : > { %1585 = vmatprep.subr.bf16.mxu0 (!%p242_p9), %v1584_v7  ;;  %s1717_s23 = scalar_lea.vmem (!%p242_p9), %s1716_s22, 256 }
  0x15   : > { %s2096_s19 = smov (!%p274_p10, %s1346_s19), 15  ;;  %1587 = vmatpush3.bf16.msra.mxu0 %v1584_v7 }
  0x16   : > { %s1347_s29 = sshll.u32 %s2096_s19, 3  ;;  %1596 = vmatprep.subr.bf16.mxu0 %v1776_v21  ;;  %s2039_s19 = scalar_lea.hbm %s2088_s7, %s1379_s15 }
  0x17   : > { %s1888_s13 = scalar_lea.vmem %s2081_s0, %s1347_s29  ;;  %s270_s29 = sand.u32 1, %s1765_s25  }
  0x18   : > { %v279_v8 = vld [vmem:[%s1888_s13] sm:$0xff]  ;;  %v281_v10 = vld [vmem:[%s1888_s13 + $0x10] sm:$0xff]  ;;  %v280_v12 = vld [vmem:[%s1888_s13 + $0x8] sm:$0xff]  ;;  %1456 = vmatmul.mubr.msk.f32.vlgmr.msra.gmra.mrb[0].mxu0 %vm352_vm0, %v338_v9  ;;  %s1345_s8 = sshll.u32 %s270_s29, 3  ;;  %s1269_s20 = scalar_lea.sflag [#allocation3], %s270_s29 }
  0x19   : > { %290 = vperm.xlu0 %1693, %v279_v8   ;;  %296 = vperm.xlu1 %1694, %v281_v10   ;;  %v282_v13 = vld [vmem:[%s1888_s13 + $0x18] sm:$0xff]  ;;  %v283_v15 = vld [vmem:[%s1888_s13 + $0x20] sm:$0xff]  ;;  %v284_v16 = vld [vmem:[%s1888_s13 + $0x28] sm:$0xff]  ;;  %s272_s16 = scalar_lea.vmem [#allocation2], %s1345_s8 }
  0x1a   : > { %1458 = vmatprep.mubr.msk.f32.mxu0 %vm352_vm0, %v339_v11  ;;  %v285_v17 = vld [vmem:[%s1888_s13 + $0x30] sm:$0xff]  ;;  %1598 = vmatpush3.bf16.msra.mxu0 %v1915_v20  ;;  %v286_v55 = vld [vmem:[%s1888_s13 + $0x38] sm:$0xff]  ;;  %s1282_s13 = sshll.u32 %s272_s16, 4  ;;  %s2041_s13 = int_to_ptr.vmem [resolvable:$true] %s1282_s13 }
  0x1b   : > { %1599 = vmatprep.subr.bf16.mxu0 %v1776_v21  ;;  %s1711_s21 = scalar_lea.vmem %s2041_s13, 128  ;;  %p1718_p0 = scmp.lt.s32.totalorder %s2041_s13, %s1716_s22 }
  0x1c   : > { %1459 = vmatmul.mubr.msk.f32.gmra.mrb[2].mxu0 %vm352_vm0, %v340_v14  ;;  %p1712_p11 = scmp.ne.s32.totalorder %s2041_s13, %s1711_s21  ;;  %p1719_p1 = scmp.lt.s32.totalorder %s1717_s23, %s1711_s21 }
  0x1d   : > { %293 = vperm.xlu0 %1693, %v280_v12   ;;  %299 = vperm.xlu1 %1694, %v282_v13  }
  0x1e   : > { %1601 = vmatpush3.bf16.msra.mxu0 %v1926_v24  ;;  %1489 = vmatprep.mubr.msk.f32.mxu0 %vm1777_vm1, %v1778_v25  ;;  %p1713_p12 = pnand %p1712_p11, %p1858_p5  ;;  %p1720_p2 = por %p1719_p1, %p1718_p0 }
  0x1f   : > { %1602 = vmatprep.subr.bf16.mxu0 %v1776_v21 }
  0x20   : > { %p1714_p13 = pneg %p1713_p12 }
  0x21   : > { %302 = vperm.xlu0 %1693, %v283_v15   ;;  %305 = vperm.xlu1 %1694, %v284_v16  }
  0x22   : > { %1490 = vmatmul.mubr.f32.vlgmr.msra.gmra.mrb[4].mxu0 %v1778_v25  ;;  %p1721_p3 = pnand %p1720_p2, %p1714_p13 }
  0x23   : > { %1604 = vmatpush3.bf16.msra.mxu0 %v1915_v20  ;;  %1500 = vmatprep.mubr.msk.f32.mxu0 %vm1777_vm1, %v1778_v25 }
  0x24   : > { %1605 = vmatprep.subr.bf16.mxu0 %v1776_v21 }
  0x25   : > { %308 = vperm.xlu0 %1693, %v285_v17   ;;  %311 = vperm.xlu1 %1694, %v286_v55  }
  0x27   : > { %1607 = vmatpush3.bf16.msra.mxu0 %v1926_v24 }
  0x28   : > { %1614 = vmatprep.subr.bf16.mxu0 %v1776_v21 }
  0x98   : > { %v291_v28 = vpop.permute.xlu0 %290  ;;  %v297_v34 = vpop.permute.xlu1 %296 }
  0x99   : > { %vm313_vm2 = vcmp.eq.s32.totalorder %v291_v28, %v1939_v27  ;;  %vm315_vm3 = vcmp.eq.s32.totalorder %v297_v34, %v1939_v27 }
  0x9a   : > { %v1348_v29 = vsel %vm313_vm2, 1.0, %v1778_v25  ;;  %v1350_v45 = vsel %vm315_vm3, 1.0, %v1778_v25 }
  0x9b   : > { %1469 = vmatprep.mubr.msk.f32.mxu1 %vm352_vm0, %v1348_v29 }
  0x9c   : > { %v294_v36 = vpop.permute.xlu0 %293  ;;  %v300_v42 = vpop.permute.xlu1 %299 }
  0x9d   : > { %vm314_vm4 = vcmp.eq.s32.totalorder %v294_v36, %v1939_v27  ;;  %vm316_vm5 = vcmp.eq.s32.totalorder %v300_v42, %v1939_v27 }
  0x9e   : > { %v1349_v46 = vsel %vm314_vm4, 1.0, %v1778_v25  ;;  %v1351_v48 = vsel %vm316_vm5, 1.0, %v1778_v25 }
  0xa0   : > { %v303_v44 = vpop.permute.xlu0 %302  ;;  %v306_v47 = vpop.permute.xlu1 %305 }
  0xa1   : > { %vm317_vm6 = vcmp.eq.s32.totalorder %v303_v44, %v1939_v27  ;;  %vm318_vm7 = vcmp.eq.s32.totalorder %v306_v47, %v1939_v27 }
  0xa2   : > { %v1352_v50 = vsel %vm317_vm6, 1.0, %v1778_v25  ;;  %v1353_v51 = vsel %vm318_vm7, 1.0, %v1778_v25 }
  0xa4   : > { %v309_v49 = vpop.permute.xlu0 %308  ;;  %v312_v60 = vpop.permute.xlu1 %311 }
  0xa5   : > { %vm319_vm8 = vcmp.eq.s32.totalorder %v309_v49, %v1939_v27  ;;  %vm320_vm9 = vcmp.eq.s32.totalorder %v312_v60, %v1939_v27 }
  0xa6   : > { %v1354_v52 = vsel %vm319_vm8, 1.0, %v1778_v25  ;;  %v1355_v61 = vsel %vm320_vm9, 1.0, %v1778_v25 }
  0xeb   : > { %v1457_v31 = vpop.f32.mrb[0].mxu0 }
  0xec   : > { %v437_v32 = vadd.f32 %v1457_v31, %v1356_v30  ;;  %v431_v33 = vpop.f32.mrb[1].mxu0  ;;  %v1184_v31 = vld [vmem:[%s2086_s5 + $0x8] sm:$0xff] }
  0xed   : > { %v432_v35 = vadd.f32 %v1356_v30, %v431_v33  ;;  %v1186_v33 = vld [vmem:[%s2086_s5 + $0x18] sm:$0xff] }
  0xef   : > { %v1460_v37 = vpop.f32.mrb[2].mxu0  ;;  %v1588_v38 = vpack.c.bf16 %v437_v32, %v432_v35 }
  0xf0   : > { %v447_v39 = vadd.f32 %v1460_v37, %v1356_v30  ;;  %v441_v40 = vpop.f32.mrb[3].mxu0 }
  0xf1   : > { %v442_v41 = vadd.f32 %v1356_v30, %v441_v40  ;;  %1589 = vmatprep.subr.bf16.mxu1 %v1588_v38 }
  0xf2   : > { %1591 = vmatpush3.bf16.msra.mxu1 %v1588_v38 }
  0xf3   : > { %v1592_v43 = vpack.c.bf16 %v447_v39, %v442_v41  ;;  %v1376_v39 = vld [vmem:[%s2087_s6] ss:$0 sm:$0xff] }
  0xf5   : > { %1593 = vmatprep.subr.bf16.mxu1 %v1592_v43  ;;  %v652_v53 = vpop.f32.mrb[4].mxu0 }
  0xf6   : > { %1595 = vmatpush3.bf16.msra.mxu1 %v1592_v43  ;;  %v1491_v54 = vpop.f32.mrb[5].mxu0 }
  0xf7   : > { %1608 = vmatprep.subr.bf16.mxu1 %v1776_v21 }
  0xf9   : > { %1470 = vmatmul.mubr.msk.f32.vlgmr.msra.gmra.mrb[0].mxu1 %vm352_vm0, %v1349_v46 }
  0xfa   : > { %1472 = vmatprep.mubr.msk.f32.mxu1 %vm352_vm0, %v1350_v45  ;;  %1610 = vmatpush3.bf16.msra.mxu1 %v1915_v20 }
  0xfb   : > { %1611 = vmatprep.subr.bf16.mxu1 %v1776_v21 }
  0xfd   : > { %1473 = vmatmul.mubr.msk.f32.gmra.mrb[2].mxu1 %vm352_vm0, %v1351_v48 }
  0xfe   : > { %1475 = vmatprep.mubr.msk.f32.mxu1 %vm352_vm0, %v1352_v50  ;;  %1613 = vmatpush3.bf16.msra.mxu1 %v1926_v24 }
  0xff   : > { %1620 = vmatprep.subr.bf16.mxu1 %v1776_v21 }
 0x101   : > { %1476 = vmatmul.mubr.msk.f32.gmra.mrb[4].mxu1 %vm352_vm0, %v1353_v51 }
 0x102   : > { %1478 = vmatprep.mubr.msk.f32.mxu1 %vm352_vm0, %v1354_v52 }
 0x105   : > { %1479 = vmatmul.mubr.msk.f32.gmra.mrb[6].mxu1 %vm352_vm0, %v1355_v61 }
 0x106   : > { %1511 = vmatprep.mubr.msk.f32.mxu1 %vm1777_vm1, %v1778_v25 }
 0x1cc   : > { %v1471_v56 = vpop.f32.mrb[0].mxu1 }
 0x1cd   : > { %v540_v57 = vpop.f32.mrb[1].mxu1 }
 0x1ce   : > { %v656_v58 = vadd.f32 %v652_v53, %v540_v57 }
 0x1d0   : > { %1695 = vtanh.f32 %v656_v58  ;;  %v1474_v62 = vpop.f32.mrb[2].mxu1 }
 0x1d1   : > { %v550_v63 = vpop.f32.mrb[3].mxu1 }
 0x1d4   : > { %v1477_v0 = vpop.f32.mrb[4].mxu1 }
 0x1d5   : > { %v560_v1 = vpop.f32.mrb[5].mxu1 }
 0x1d8   : > { %v1983_v5 = vpop.f32.mrb[6].mxu1 }
 0x1d9   : > { %v570_v6 = vpop.f32.mrb[7].mxu1 }
 0x1da   : > { %v1696_v59 = vpop.eup %1695 }
 0x1db   : > { %1501 = vmatmul.mubr.msk.f32.vlgmr.msra.gmra.mrb[6].mxu0 %vm352_vm0, %v1696_v59 }
 0x1dc   : > { %1616 = vmatpush3.bf16.msra.mxu0 %v1915_v20  ;;  %1522 = vmatprep.mubr.msk.f32.mxu0 %vm1777_vm1, %v1778_v25 }
 0x1dd   : > { %1617 = vmatprep.subr.bf16.mxu0 %v1776_v21 }
 0x1e0   : > { %1619 = vmatpush3.bf16.msra.mxu0 %v1926_v24 }
 0x1e1   : > { %1626 = vmatprep.subr.bf16.mxu0 %v1776_v21 }
 0x2ae   : > { %v727_v2 = vpop.f32.mrb[6].mxu0 }
 0x2af   : > { %v731_v3 = vadd.f32 %v1471_v56, %v727_v2  ;;  %v1502_v4 = vpop.f32.mrb[7].mxu0 }
 0x2b1   : > { %1697 = vtanh.f32 %v731_v3 }
 0x2bb   : > { %v1698_v7 = vpop.eup %1697 }
 0x2bc   : > { %1512 = vmatmul.mubr.msk.f32.vlgmr.msra.gmra.mrb[8].mxu1 %vm352_vm0, %v1698_v7 }
 0x2bd   : > { %1622 = vmatpush3.bf16.msra.mxu1 %v1915_v20  ;;  %1533 = vmatprep.mubr.msk.f32.mxu1 %vm1777_vm1, %v1778_v25 }
 0x2be   : > { %1623 = vmatprep.subr.bf16.mxu1 %v1776_v21 }
 0x2c1   : > { %1625 = vmatpush3.bf16.msra.mxu1 %v1926_v24 }
 0x2c2   : > { %1632 = vmatprep.subr.bf16.mxu1 %v1776_v21 }
 0x38f   : > { %v802_v8 = vpop.f32.mrb[8].mxu1 }
 0x390   : > { %v806_v9 = vadd.f32 %v802_v8, %v550_v63  ;;  %v1513_v10 = vpop.f32.mrb[9].mxu1 }
 0x392   : > { %1699 = vtanh.f32 %v806_v9 }
 0x39c   : > { %v1700_v11 = vpop.eup %1699 }
 0x39d   : > { %1523 = vmatmul.mubr.msk.f32.vlgmr.msra.gmra.mrb[8].mxu0 %vm352_vm0, %v1700_v11 }
 0x39e   : > { %1628 = vmatpush3.bf16.msra.mxu0 %v1915_v20  ;;  %1544 = vmatprep.mubr.msk.f32.mxu0 %vm1777_vm1, %v1778_v25 }
 0x39f   : > { %1629 = vmatprep.subr.bf16.mxu0 %v1776_v21 }
 0x3a2   : > { %1631 = vmatpush3.bf16.msra.mxu0 %v1926_v24 }
 0x3a3   : > { %1638 = vmatprep.subr.bf16.mxu0 %v1776_v21 }
 0x470   : > { %v877_v12 = vpop.f32.mrb[8].mxu0 }
 0x471   : > { %v881_v13 = vadd.f32 %v1474_v62, %v877_v12  ;;  %v1524_v14 = vpop.f32.mrb[9].mxu0 }
 0x473   : > { %1701 = vtanh.f32 %v881_v13 }
 0x47d   : > { %v1702_v15 = vpop.eup %1701 }
 0x47e   : > { %1534 = vmatmul.mubr.msk.f32.vlgmr.msra.gmra.mrb[10].mxu1 %vm352_vm0, %v1702_v15 }
 0x47f   : > { %1634 = vmatpush3.bf16.msra.mxu1 %v1915_v20  ;;  %1555 = vmatprep.mubr.msk.f32.mxu1 %vm1777_vm1, %v1778_v25 }
 0x480   : > { %1635 = vmatprep.subr.bf16.mxu1 %v1776_v21 }
 0x483   : > { %1637 = vmatpush3.bf16.msra.mxu1 %v1926_v24 }
 0x484   : > { %1644 = vmatprep.subr.bf16.mxu1 %v1776_v21 }
 0x551   : > { %v952_v16 = vpop.f32.mrb[10].mxu1 }
 0x552   : > { %v956_v17 = vadd.f32 %v952_v16, %v560_v1  ;;  %v1535_v18 = vpop.f32.mrb[11].mxu1 }
 0x554   : > { %1703 = vtanh.f32 %v956_v17 }
 0x55e   : > { %v1704_v19 = vpop.eup %1703 }
 0x55f   : > { %1545 = vmatmul.mubr.msk.f32.vlgmr.msra.gmra.mrb[10].mxu0 %vm352_vm0, %v1704_v19 }
 0x560   : > { %1640 = vmatpush3.bf16.msra.mxu0 %v1915_v20  ;;  %1566 = vmatprep.mubr.msk.f32.mxu0 %vm1777_vm1, %v1778_v25 }
 0x561   : > { %1641 = vmatprep.subr.bf16.mxu0 %v1776_v21 }
 0x564   : > { %1643 = vmatpush3.bf16.msra.mxu0 %v1926_v24  ;;  %v1183_v24 = vld [vmem:[%s2086_s5] sm:$0xff] }
 0x565   : > { %v1645_v32 = vpack.c.bf16 %v1184_v31, %v1183_v24 }
 0x632   : > { %v1027_v22 = vpop.f32.mrb[10].mxu0 }
 0x633   : > { %v1031_v23 = vadd.f32 %v1477_v0, %v1027_v22  ;;  %v1546_v26 = vpop.f32.mrb[11].mxu0 }
 0x635   : > { %1705 = vtanh.f32 %v1031_v23 }
 0x63f   : > { %v1706_v27 = vpop.eup %1705 }
 0x640   : > { %1556 = vmatmul.mubr.msk.f32.vlgmr.msra.gmra.mrb[12].mxu1 %vm352_vm0, %v1706_v27 }
 0x641   : > { %1577 = vmatprep.mubr.msk.f32.mxu1 %vm1777_vm1, %v1778_v25  ;;  %v1185_v25 = vld [vmem:[%s2086_s5 + $0x10] sm:$0xff]  ;;  %1646 = vmatpush3.bf16.msra.mxu1 %v1645_v32 }
 0x642   : > { %v1648_v34 = vpack.c.bf16 %v1186_v33, %v1185_v25  ;;  %1647 = vmatprep.subr.bf16.mxu1 %v1776_v21 }
 0x645   : > { %1649 = vmatpush3.bf16.msra.mxu1 %v1648_v34 }
 0x713   : > { %v1102_v28 = vpop.f32.mrb[12].mxu1 }
 0x714   : > { %v1106_v29 = vadd.f32 %v1102_v28, %v570_v6  ;;  %v1557_v20 = vpop.f32.mrb[13].mxu1 }
 0x716   : > { %1707 = vtanh.f32 %v1106_v29 }
 0x720   : > { %v1708_v30 = vpop.eup %1707 }
 0x721   : > { %1567 = vmatmul.mubr.msk.f32.vlgmr.msra.gmra.mrb[12].mxu0 %vm352_vm0, %v1708_v30 }
 0x7f4   : > { %v1177_v35 = vpop.f32.mrb[12].mxu0 }
 0x7f5   : > { %v1181_v36 = vadd.f32 %v1983_v5, %v1177_v35  ;;  %v1568_v37 = vpop.f32.mrb[13].mxu0 }
 0x7f7   : > { %1709 = vtanh.f32 %v1181_v36 }
 0x801   : > { %v1710_v38 = vpop.eup %1709 }
 0x802   : > { %1578 = vmatmul.mubr.msk.f32.vlgmr.msra.gmra.mrb[14].mxu1 %vm352_vm0, %v1710_v38 }
 0x8d5   : > { %v1263_v21 = vpop.f32.mrb[14].mxu1 }
 0x8d6   : > { %v1264_v40 = vadd.f32 %v1376_v39, %v1263_v21  ;;  %v1579_v41 = vpop.f32.mrb[15].mxu1 }
 0x8d8   : > { %1267 = vst [vmem:[%s272_s16] sm:$0xff] %v1264_v40 }
 0x8d9   : > { %1724 = shalt.err (!%p1721_p3)
}
 0x8da   : > { %s1725_s29 = scalar_lea.hbm %s2039_s19, 128  ;;  %s1729_s14 = scalar_lea.hbm %s2088_s7, 256 }
 0x8db   : > { %p1726_p4 = scmp.ne.s32.totalorder %s2039_s19, %s1725_s29  ;;  %p1730_p9 = scmp.lt.u32.totalorder %s2039_s19, %s2088_s7 }
 0x8dc   : > { %p1731_p10 = scmp.lt.u32.totalorder %s1729_s14, %s1725_s29  ;;  %p1733_p12 = scmp.lt.u32.totalorder %s1725_s29, %s2039_s19 }
 0x8dd   : > { %p1727_p7 = pnand %p1726_p4, %p1858_p5 }
 0x8de   : > { %p1732_p11 = por %p1731_p10, %p1730_p9 }
 0x8df   : > { %p1728_p8 = pneg %p1727_p7 }
 0x8e0   : > { %p1734_p13 = por %p1733_p12, %p1732_p11 }
 0x8e2   : > { %p1735_p0 = pnand %p1734_p13, %p1728_p8 }
 0x8e4   : > { %1738 = shalt.err (!%p1735_p0)
}
 0x8e5   : > { %1650 = dma.vmem_to_hbm [thread:$0]  (%p1858_p5), %s2041_s13, 128, %s2039_s19, %s1269_s20  }
 0x8e6 PF: > { %p1656_p1 = scmp.ge.s32.totalorder %s1773_s27, 2  ;;  %s1294_s17 = sand.u32 1, %s1761_s24  }
 0x8e7   : > { %s1295_s18 = scalar_lea.sflag [#allocation3], %s1294_s17 }
 0x8e8   : > { %p1653_p2 = pnand %p1656_p1, %p1862_p6 }
 0x8ea   : > { %1756 = dma.done.wait (!%p1653_p2), %s1295_s18, 128  }
 0x8eb   : > { %1758 = vsyncadd (!%p1653_p2), %s1295_s18, 4294967168  ;;  %p17_p3 = scmp.ge.s32.totalorder %s1845_s30, 4   ;;  %s2091_s24 = smov %s1765_s25 }
 0x8ec   : > { %s2092_s25 = smov %s1769_s26  ;;  %s2093_s26 = smov %s1856_s10 }
 0x8ed   : > { %s2094_s27 = smov %s1845_s30  ;;  %19 = sbr.rel (!%p17_p3) target bundleno = 3 (0x3), region = 83 }
 0x8f4   :  { %1300 = vsyncpa [#allocation3], 1 }
 0x8f5   :  { %1302 = vsyncpa [#allocation3 + $0x1], 1 }

</bundles_post_ra>
